<compile_context>
chip_gen: v7x
topology: tpu7x:2x2x1
jax: 0.10.0
libtpu: 0.0.40
codegen_flags: <defaults>
</compile_context>

<pallas_src>
import functools

import jax
import jax.numpy as jnp
import numpy as np
from jax.experimental import pallas as pl
from jax.experimental.pallas import tpu as pltpu


# -----------------------------------------------------------------------------
# Parameter setup (plain JAX glue, mirrors AnchorGenerator.__init__)
# -----------------------------------------------------------------------------
def generate_base_anchors(sizes, aspect_ratios):
    """Mirror of AnchorGenerator.generate_base_anchors + the per-size concat."""
    ars = jnp.asarray(aspect_ratios, dtype=jnp.float32)
    h_ratios = jnp.sqrt(ars)                      # (nR,)
    w_ratios = 1.0 / h_ratios                     # (nR,)
    per_size = []
    for s in sizes:
        sz = jnp.asarray([s], dtype=jnp.float32)  # (1,)
        ws = (w_ratios[:, None] * sz[None, :]).reshape(-1)   # (nR,)
        hs = (h_ratios[:, None] * sz[None, :]).reshape(-1)   # (nR,)
        # torch.round == round-half-to-even == jnp.round
        per_size.append(jnp.round(jnp.stack([-ws, -hs, ws, hs], axis=1) / 2.0))
    return jnp.concatenate(per_size, axis=0)      # (len(sizes)*nR, 4)


# -----------------------------------------------------------------------------
# Pallas kernel: each grid step emits `tile_rows` feature-map rows as a
# lane-dense (tile_rows, W_pad) slab.  consts[0] = x-shifts + base anchors,
# consts[1] = y-mask with stride_y already folded in.
# -----------------------------------------------------------------------------
def _anchor_kernel(const_ref, out_ref, *, tile_rows):
    rp = const_ref[0]                                   # (1, W_pad) row pattern
    ym = const_ref[1]                                   # (1, W_pad) stride_y * y_mask
    row0 = pl.program_id(0) * tile_rows
    row = jax.lax.broadcasted_iota(jnp.int32, out_ref.shape, 0) + row0
    # single multiply-add per element
    out_ref[...] = rp + row.astype(jnp.float32) * ym


# -----------------------------------------------------------------------------
# Tiling helpers
# -----------------------------------------------------------------------------
def _round_up(x, m):
    return ((x + m - 1) // m) * m


def _tpu_budgets():
    """(per-block VMEM budget, force >=2 grid steps for 2-TC chips)."""
    try:
        info = pltpu.get_tpu_info()
        vmem = int(getattr(info, "vmem_capacity_bytes", 128 << 20))
    except Exception:
        vmem = 128 << 20
    if vmem <= (64 << 20):
        # v7x-class: 64 MiB VMEM (32 MiB scoped default), 2 TensorCores/chip.
        return 8 << 20, True
    # v5e / v6e: 128 MiB VMEM, single TensorCore; bigger tiles amortize the
    # ~0.35 us/step cost against slower HBM.
    return 12 << 20, False


def _pick_tiling(rows8, row_bytes, budget, force_multi):
    t = max(8, ((budget // row_bytes) // 8) * 8)       # sublane-aligned
    tile_rows = min(rows8, t)
    n_steps = pl.cdiv(rows8, tile_rows)
    if force_multi:
        if n_steps == 1 and rows8 >= 16:
            # Never leave a TensorCore idle on 2-TC chips.
            tile_rows = max(8, _round_up(pl.cdiv(rows8, 2), 8))
            n_steps = pl.cdiv(rows8, tile_rows)
        elif n_steps > 1 and n_steps % 2 == 1:
            cand = max(8, _round_up(pl.cdiv(rows8, n_steps + 1), 8))
            if pl.cdiv(rows8, cand) % 2 == 0:
                tile_rows = cand
                n_steps = pl.cdiv(rows8, cand)
            # else: accept <= 1-block imbalance between the two cores.
    return tile_rows, n_steps


# -----------------------------------------------------------------------------
# Forward
# -----------------------------------------------------------------------------
def anchor_generator_forward(base_anchors, fmap_dims, img_dims, *, force_pallas=False):
    """Returns anchors of shape (fh * fw * nA, 4), dtype float32."""
    fh, fw = fmap_dims
    h, w = img_dims
    stride_x = int(w / fw)   # matches torch's int(w / fw)
    stride_y = int(h / fh)
    n_anchors = base_anchors.shape[0]
    W = fw * n_anchors * 4                       # true lane-dense row width

    # Tiny outputs: the pallas_call launch/pipeline prologue dominates; let XLA
    # fuse the plain-JAX formulation into the consumer instead.
    if not force_pallas and fh * W * 4 < (1 << 20):
        return anchor_generator_reference(base_anchors, fmap_dims, img_dims)

    W_pad = _round_up(W, 128)                    # unmasked full-width stores

    # ---- grid-invariant constants (hoisted out of the kernel) ---------------
    shift_x = jnp.arange(fw, dtype=jnp.float32) * jnp.float32(stride_x)   # (fw,)
    x_mask4 = jnp.array([1.0, 0.0, 1.0, 0.0], dtype=jnp.float32)          # xmin,xmax
    y_mask4 = jnp.array([0.0, 1.0, 0.0, 1.0], dtype=jnp.float32)          # ymin,ymax
    row_pattern = (
        shift_x[:, None, None] * x_mask4[None, None, :]
        + base_anchors.astype(jnp.float32)[None, :, :]
    ).reshape(W)
    y_mask_scaled = jnp.tile(y_mask4, fw * n_anchors) * jnp.float32(stride_y)  # (W,)
    pad = W_pad - W
    if pad:
        row_pattern = jnp.pad(row_pattern, (0, pad))
        y_mask_scaled = jnp.pad(y_mask_scaled, (0, pad))
    consts = jnp.stack([row_pattern, y_mask_scaled], axis=0).reshape(2, 1, W_pad)

    # ---- tiling / grid -------------------------------------------------------
    rows8 = _round_up(fh, 8)
    row_bytes = W_pad * 4
    budget, force_multi = _tpu_budgets()
    tile_rows, n_steps = _pick_tiling(rows8, row_bytes, budget, force_multi)
    rows_pad = n_steps * tile_rows               # every block fully in-bounds

    block_bytes = tile_rows * row_bytes
    const_bytes = 8 * W_pad * 4                  # (2,1,W) pads to 8 sublanes / index
    vmem_limit = max(2 * block_bytes + 2 * const_bytes + (4 << 20), 32 << 20)

    kernel = functools.partial(_anchor_kernel, tile_rows=tile_rows)

    out = pl.pallas_call(
        kernel,
        out_shape=jax.ShapeDtypeStruct((rows_pad, W_pad), jnp.float32),
        grid=(n_steps,),
        in_specs=[
            # merged grid-invariant constants, fetched once (constant index_map)
            pl.BlockSpec((2, 1, W_pad), lambda i: (0, 0, 0)),
        ],
        out_specs=pl.BlockSpec((tile_rows, W_pad), lambda i: (i, 0)),
        compiler_params=pltpu.CompilerParams(
            dimension_semantics=(("parallel",) if n_steps > 1 else ("arbitrary",)),
            vmem_limit_bytes=int(vmem_limit),
        ),
        cost_estimate=pl.CostEstimate(
            flops=2 * rows_pad * W_pad,
            transcendentals=0,
            bytes_accessed=rows_pad * W_pad * 4 + 2 * W_pad * 4,
        ),
    )(consts)

    # Strip row/column padding; (fh, W) row-major == (fh, fw, nA, 4) row-major.
    return out[:fh, :W].reshape(-1, 4)


# -----------------------------------------------------------------------------
# Pure-JAX reference (direct transcription of the PyTorch forward)
# -----------------------------------------------------------------------------
def anchor_generator_reference(base_anchors, fmap_dims, img_dims):
    fh, fw = fmap_dims
    h, w = img_dims
    shift_x = jnp.arange(0, fw, dtype=jnp.float32) * int(w / fw)
    shift_y = jnp.arange(0, fh, dtype=jnp.float32) * int(h / fh)
    sy, sx = jnp.meshgrid(shift_y, shift_x, indexing="ij")
    sx = sx.reshape(-1)
    sy = sy.reshape(-1)
    shifts = jnp.stack((sx, sy, sx, sy), axis=1)
    return (shifts.reshape(-1, 1, 4)
            + base_anchors.astype(jnp.float32).reshape(1, -1, 4)).reshape(-1, 4)


if __name__ == "__main__":
    # Deterministic "parameters" (base anchors), small shapes.
    sizes = [32, 64]
    aspect_ratios = [0.5, 1.0, 2.0]
    base_anchors = generate_base_anchors(sizes, aspect_ratios)   # (6, 4)

    _ = jax.random.PRNGKey(0)   # harness convention; forward consumes dims only

    # --- Pallas path, W already lane-aligned (W = 16*6*4 = 384) --------------
    fmap_a, img_a = (16, 16), (128, 128)
    out_a = jax.block_until_ready(
        anchor_generator_forward(base_anchors, fmap_a, img_a, force_pallas=True))
    ref_a = anchor_generator_reference(base_anchors, fmap_a, img_a)
    assert out_a.shape == (fmap_a[0] * fmap_a[1] * base_anchors.shape[0], 4)
    assert out_a.dtype == jnp.float32
    np.testing.assert_allclose(np.asarray(out_a), np.asarray(ref_a), rtol=0, atol=0)

    # --- Pallas path exercising W padding (480 -> 512) and row padding -------
    fmap_b, img_b = (20, 20), (160, 160)
    out_b = jax.block_until_ready(
        anchor_generator_forward(base_anchors, fmap_b, img_b, force_pallas=True))
    ref_b = anchor_generator_reference(base_anchors, fmap_b, img_b)
    assert out_b.shape == (fmap_b[0] * fmap_b[1] * base_anchors.shape[0], 4)
    np.testing.assert_allclose(np.asarray(out_b), np.asarray(ref_b), rtol=0, atol=0)

    # --- small-shape bypass (pure-JAX path, XLA fuses into consumer) ----------
    out_c = jax.block_until_ready(
        anchor_generator_forward(base_anchors, fmap_a, img_a))
    np.testing.assert_allclose(np.asarray(out_c), np.asarray(ref_a), rtol=0, atol=0)

    print("KERNEL_OK")
</pallas_src>

<mosaic_0001>
module attributes {stable_mosaic.version = 11 : i64} {
  func.func @_anchor_kernel(%arg0: i32, %arg1: memref<2x1x384xf32, #tpu.memory_space<vmem>>, %arg2: memref<16x384xf32, #tpu.memory_space<vmem>>) attributes {dimension_semantics = [#tpu.dimension_semantics<arbitrary>], iteration_bounds = array<i64: 1>, scalar_prefetch = 0 : i64, scratch_operands = 0 : i64, tpu.core_type = #tpu.core_type<tc>, window_params = [{pipeline_mode = #tpu.pipeline_mode<synchronous>, transform_indices = @transform_0, window_bounds = array<i64: 2, 1, 384>}, {transform_indices = @transform_1, window_bounds = array<i64: 16, 384>}]} {
    %c0 = arith.constant 0 : index
    %c0_0 = arith.constant 0 : index
    %c0_1 = arith.constant 0 : index
    %0 = vector.load %arg1[%c0, %c0_0, %c0_1] : memref<2x1x384xf32, #tpu.memory_space<vmem>>, vector<1x1x384xf32>
    %1 = vector.shape_cast %0 : vector<1x1x384xf32> to vector<1x384xf32>
    %c1 = arith.constant 1 : index
    %c0_2 = arith.constant 0 : index
    %c0_3 = arith.constant 0 : index
    %2 = vector.load %arg1[%c1, %c0_2, %c0_3] : memref<2x1x384xf32, #tpu.memory_space<vmem>>, vector<1x1x384xf32>
    %3 = vector.shape_cast %2 : vector<1x1x384xf32> to vector<1x384xf32>
    %c16_i32 = arith.constant 16 : i32
    %4 = arith.muli %arg0, %c16_i32 : i32
    %5 = tpu.iota {dimensions = array<i32: 0>} : vector<16x384xi32>
    %6 = vector.broadcast %4 : i32 to vector<16x384xi32>
    %7 = arith.addi %5, %6 : vector<16x384xi32>
    %8 = arith.sitofp %7 : vector<16x384xi32> to vector<16x384xf32>
    %9 = vector.broadcast %3 : vector<1x384xf32> to vector<16x384xf32>
    %10 = arith.mulf %8, %9 : vector<16x384xf32>
    %11 = vector.broadcast %1 : vector<1x384xf32> to vector<16x384xf32>
    %12 = arith.addf %11, %10 : vector<16x384xf32>
    %c0_4 = arith.constant 0 : index
    %c0_5 = arith.constant 0 : index
    %13 = vector.load %arg2[%c0_4, %c0_5] : memref<16x384xf32, #tpu.memory_space<vmem>>, vector<16x384xf32>
    tpu.vector_store %arg2[%c0_4, %c0_5], %12 {strides = array<i32>} : memref<16x384xf32, #tpu.memory_space<vmem>>, vector<16x384xf32>,
    return
  }
  func.func @transform_0(%arg0: i32) -> (i32, i32, i32) {
    %c0_i32 = arith.constant 0 : i32
    %c0_i32_0 = arith.constant 0 : i32
    %c0_i32_1 = arith.constant 0 : i32
    %c0_i32_2 = arith.constant 0 : i32
    return %c0_i32, %c0_i32_0, %c0_i32_1 : i32, i32, i32
  }
  func.func @transform_1(%arg0: i32) -> (i32, i32) {
    %c0_i32 = arith.constant 0 : i32
    %c0_i32_0 = arith.constant 0 : i32
    return %arg0, %c0_i32 : i32, i32
  }
}

</mosaic_0001>

<bundles_post_ra>
// kernel: tpu_custom_call.1
= control target key start
LH: loop header
LB: loop body
LE: loop exit
PB: predicated region body
PF: predicated region fallthrough
CT: control target
= control target key end

     0   :  { %6 = vsyncpa [#allocation3], 0  ;;  %s196_s0 = inlined_call_operand.hbm [shape: f32[2,1,384], index: 0, kind: input, shape index: {}]   ;;  %s197_s1 = inlined_call_operand.hbm [shape: f32[16,384], index: 1, kind: output, shape index: {}]  }
   0x1   :  { %7 = vsyncpa [#allocation4], 0  ;;  %s156_s6 = smov [#allocation2]   ;;  %s108_s10 = scalar_lea.hbm %s196_s0, 96 }
   0x2   :  { %s13_s7 = sshll.u32 %s156_s6, 4  ;;  %p109_p0 = scmp.ne.s32.totalorder %s196_s0, %s108_s10  ;;  %s14_s7 = int_to_ptr.vmem [resolvable:$true] %s13_s7 }
   0x3   :  { %p112_p1 = scmp.lt.u32.totalorder %s108_s10, %s196_s0 }
   0x5   :  { %p114_p2 = pnand %p112_p1, %p109_p0 }
   0x7   :  { %117 = shalt.err (!%p114_p2)
}
   0x8   :  { %s118_s15 = scalar_lea.vmem %s14_s7, 96  ;;  %p123_p4 = scmp.lt.s32.totalorder %s14_s7, %s14_s7 }
   0x9   :  { %p119_p3 = scmp.ne.s32.totalorder %s14_s7, %s118_s15  ;;  %p124_p5 = scmp.lt.s32.totalorder %s118_s15, %s118_s15 }
   0xb   :  { %p125_p6 = por %p124_p5, %p123_p4 }
   0xd   :  { %p126_p7 = pnand %p125_p6, %p119_p3 }
   0xf   :  { %129 = shalt.err (!%p126_p7)
}
  0x10   :  { %s157_s16 = smov 48   ;;  %s158_s17 = smov 3  }
  0x11   :  { %19 = dma.hbm_to_vmem [thread:$0]  %s196_s0, 96, %s14_s7, [#allocation3], %s157_s16, %s157_s16, %s158_s17  }
  0x12   :  { %152 = dma.done.wait [#allocation3], 96  }
  0x13   :  { %153 = vsyncadd [#allocation3], 4294967200  ;;  %v27_v0 = vlaneseq  ;;  %v23_v7 = vld [vmem:[#allocation2] sm:$0x7]  ;;  %v25_v8 = vld [vmem:[#allocation2 + $0x3] sm:$0x7] }
  0x14   :  { %s159_s0 = smov [#allocation5]  }
  0x15   :  { %v28_v1 = vshrl.u32 %v27_v0, 7  ;;  %s90_s20 = sshll.u32 %s159_s0, 4  ;;  %s91_s20 = int_to_ptr.vmem [resolvable:$true] %s90_s20 }
  0x16   :  { %s130_s21 = scalar_lea.vmem %s91_s20, 768  ;;  %p135_p9 = scmp.lt.s32.totalorder %s91_s20, %s91_s20 }
  0x17   :  { %v38_v2 = vsub.s32 0, %v28_v1  ;;  %v42_v3 = vsub.s32 1, %v28_v1  ;;  %v46_v4 = vsub.s32 2, %v28_v1  ;;  %v29_v5 = vadd.s32 8, %v28_v1  ;;  %p131_p8 = scmp.ne.s32.totalorder %s91_s20, %s130_s21  ;;  %p136_p10 = scmp.lt.s32.totalorder %s130_s21, %s130_s21 }
  0x18   :  { %v33_v6 = vcvt.s32.f32 %v28_v1 }
  0x19   :  { %v34_v9 = vcvt.s32.f32 %v29_v5  ;;  %v39_v10 = vrot.slane %v25_v8, %v38_v2  ;;  %v61_v11 = vrot.slane %v23_v7, %v38_v2  ;;  %v43_v12 = vrot.slane %v25_v8, %v42_v3  ;;  %p137_p11 = por %p136_p10, %p135_p9 }
  0x1a   :  { %v65_v13 = vrot.slane %v23_v7, %v42_v3  ;;  %v47_v14 = vrot.slane %v25_v8, %v46_v4  ;;  %v69_v15 = vrot.slane %v23_v7, %v46_v4 }
  0x1b   :  { %v51_v16 = vmul.f32 %v39_v10, %v33_v6  ;;  %v52_v17 = vmul.f32 %v43_v12, %v33_v6  ;;  %v54_v18 = vmul.f32 %v39_v10, %v34_v9  ;;  %v55_v19 = vmul.f32 %v43_v12, %v34_v9  ;;  %p138_p12 = pnand %p137_p11, %p131_p8 }
  0x1c   :  { %v53_v20 = vmul.f32 %v47_v14, %v33_v6  ;;  %v56_v21 = vmul.f32 %v47_v14, %v34_v9 }
  0x1d   :  { %v73_v22 = vadd.f32 %v61_v11, %v51_v16  ;;  %v74_v23 = vadd.f32 %v65_v13, %v52_v17  ;;  %v76_v24 = vadd.f32 %v61_v11, %v54_v18  ;;  %v77_v25 = vadd.f32 %v65_v13, %v55_v19 }
  0x1e   :  { %v75_v26 = vadd.f32 %v69_v15, %v53_v20  ;;  %v78_v27 = vadd.f32 %v69_v15, %v56_v21 }
  0x1f   :  { %79 = vst [vmem:[#allocation5] sm:$0xff] %v73_v22  ;;  %80 = vst [vmem:[#allocation5 + $0x8] sm:$0xff] %v74_v23 }
  0x20   :  { %82 = vst [vmem:[#allocation5 + $0x18] sm:$0xff] %v76_v24  ;;  %83 = vst [vmem:[#allocation5 + $0x20] sm:$0xff] %v77_v25 }
  0x21   :  { %81 = vst [vmem:[#allocation5 + $0x10] sm:$0xff] %v75_v26  ;;  %84 = vst [vmem:[#allocation5 + $0x28] sm:$0xff] %v78_v27 }
  0x22   :  { %141 = shalt.err (!%p138_p12)
}
  0x23   :  { %s142_s24 = scalar_lea.hbm %s197_s1, 768 }
  0x24   :  { %p143_p13 = scmp.ne.s32.totalorder %s197_s1, %s142_s24  ;;  %p146_p0 = scmp.lt.u32.totalorder %s142_s24, %s197_s1 }
  0x26   :  { %p148_p1 = pnand %p146_p0, %p143_p13 }
  0x28   :  { %151 = shalt.err (!%p148_p1)
}
  0x29   :  { %s160_s29 = smov 384   ;;  %s161_s30 = smov 24  }
  0x2a   :  { %96 = dma.vmem_to_hbm [thread:$0]  %s91_s20, 768, %s197_s1, [#allocation4], %s160_s29, %s160_s29, %s161_s30  }
  0x2b   :  { %154 = dma.done.wait [#allocation4], 768  }
  0x2c   :  { %155 = vsyncadd [#allocation4], 4294966528 }
  0x2d   :  { %100 = vsyncpa [#allocation3], 1 }
  0x2e   :  { %101 = vsyncpa [#allocation4], 1 }

</bundles_post_ra>
